<compile_context>
chip_gen: v7x
topology: tpu7x:2x2x1
jax: 0.10.0
libtpu: 0.0.40
codegen_flags: <defaults>
</compile_context>

<pallas_src>
import functools

import numpy as np
import jax
import jax.numpy as jnp
from jax import lax
from jax.experimental import pallas as pl
from jax.experimental.pallas import tpu as pltpu


def _round_up(x, m):
    return ((x + m - 1) // m) * m


def _clamp_vmem(needed_bytes):
    # Raise the scoped VMEM limit when useful, but stay well under v7x's
    # 64 MiB/TC physical VMEM (generation-aware conservative clamp).
    return int(min(max(needed_bytes + (8 << 20), 16 << 20), 48 << 20))


# ----------------------------------------------------------------------------
# Pass 1: PHAT whitening + frame-sum reduction (C streamed exactly once)
# ----------------------------------------------------------------------------
def _whiten_reduce_kernel(c_ref, g_ref, *, eps):
    t = pl.program_id(0)

    @pl.when(t == 0)
    def _():
        g_ref[...] = jnp.zeros_like(g_ref)

    # f32 whitening (lowers on v5e; a bf16 variant would be ~2x VPU/EUP on v6e/v7x).
    cr = c_ref[0].astype(jnp.float32)                    # (Bp, Tt, Kp)
    ci = c_ref[1].astype(jnp.float32)
    inv_mag = lax.rsqrt(cr * cr + ci * ci + eps * eps)   # one EUP rsqrt per bin
    g_ref[0, :, :] += jnp.sum(cr * inv_mag, axis=1)      # (Bp, Kp) frame partial sum
    g_ref[1, :, :] += jnp.sum(ci * inv_mag, axis=1)


def srp_whiten_reduce(c_stacked, *, eps, t_tile, vmem_limit):
    """c_stacked: (2, Bp, Tp, Kp) bf16 -> G: (2, Bp, Kp) f32 (whitened, frame-summed)."""
    _, Bp, Tp, Kp = c_stacked.shape
    assert Tp % t_tile == 0
    kernel = functools.partial(_whiten_reduce_kernel, eps=eps)
    return pl.pallas_call(
        kernel,
        out_shape=jax.ShapeDtypeStruct((2, Bp, Kp), jnp.float32),
        grid=(Tp // t_tile,),
        in_specs=[pl.BlockSpec((2, Bp, t_tile, Kp), lambda t: (0, 0, t, 0))],
        out_specs=pl.BlockSpec((2, Bp, Kp), lambda t: (0, 0, 0)),
        compiler_params=pltpu.CompilerParams(
            dimension_semantics=("arbitrary",),
            vmem_limit_bytes=vmem_limit),
    )(c_stacked)


# ----------------------------------------------------------------------------
# Pass 2: steered-response power map (one fused bf16 MXU matmul per D tile)
# ----------------------------------------------------------------------------
def _steered_power_kernel(g_ref, s_ref, p_ref):
    gr = g_ref[0].astype(jnp.bfloat16)                   # cast once, no VMEM staging
    gi = g_ref[1].astype(jnp.bfloat16)
    p_ref[...] = (jnp.dot(gr, s_ref[0], preferred_element_type=jnp.float32) +
                  jnp.dot(gi, s_ref[1], preferred_element_type=jnp.float32))


def srp_steered_power(g, s, *, d_tile, vmem_limit):
    """g: (2, Bp, Kp) f32, s: (2, Kp, Dp) bf16 -> P: (Bp, Dp) f32."""
    _, Bp, Kp = g.shape
    _, Kp2, Dp = s.shape
    assert Kp2 == Kp and Dp % d_tile == 0
    return pl.pallas_call(
        _steered_power_kernel,
        out_shape=jax.ShapeDtypeStruct((Bp, Dp), jnp.float32),
        grid=(Dp // d_tile,),
        in_specs=[pl.BlockSpec((2, Bp, Kp), lambda d: (0, 0, 0)),
                  pl.BlockSpec((2, Kp, d_tile), lambda d: (0, 0, d))],
        out_specs=pl.BlockSpec((Bp, d_tile), lambda d: (0, d)),
        compiler_params=pltpu.CompilerParams(
            dimension_semantics=("parallel",),   # shards D tiles across 2 TCs on v7x
            vmem_limit_bytes=vmem_limit),
    )(g, s)


# Pure-JAX reference mirroring the kernel numerics (sanity check only).
def _ref_power_map(c_stacked, s, eps=1e-8):
    cr = c_stacked[0].astype(jnp.float32)
    ci = c_stacked[1].astype(jnp.float32)
    inv = lax.rsqrt(cr * cr + ci * ci + eps * eps)
    gr = jnp.sum(cr * inv, axis=1).astype(jnp.bfloat16)
    gi = jnp.sum(ci * inv, axis=1).astype(jnp.bfloat16)
    return (jnp.dot(gr, s[0], preferred_element_type=jnp.float32) +
            jnp.dot(gi, s[1], preferred_element_type=jnp.float32))


# ----------------------------------------------------------------------------
# SRPPHATDoA module (JAX / Pallas)
# ----------------------------------------------------------------------------
class SRPPHATDoAPallas:
    def __init__(self, n_fft, window_length, hop_length, microphone_positions,
                 sample_rate=16000, center=False, window_type="hann",
                 elevation_resolution=5.0, azimuth_resolution=5.0,
                 elevation_range=(0.0, 180.0), azimuth_range=(-180.0, 180.0),
                 c_sound=343.0, frequency_range=None,
                 d_tile_target=512, frame_tile_target=1024,
                 c_vmem_budget_bytes=24 << 20, s_vmem_budget_bytes=12 << 20):
        self.n_fft = int(n_fft)
        self.window_length = int(window_length)
        self.hop_length = int(hop_length)
        self.sample_rate = sample_rate
        self.center = center
        self.c_sound = c_sound
        self.eps = 1e-8
        self.frame_tile_target = max(8, (int(frame_tile_target) // 8) * 8)
        self.c_vmem_budget = int(c_vmem_budget_bytes)
        self.s_vmem_budget = int(s_vmem_budget_bytes)

        mic_pos = np.asarray(microphone_positions, np.float32)       # (M, 3)
        self.n_mics = mic_pos.shape[0]
        self.pairs = np.asarray(
            [(i, j) for i in range(self.n_mics) for j in range(i + 1, self.n_mics)],
            np.int32)
        n_pairs = self.pairs.shape[0]

        # candidate direction grid (degrees)
        self.elevs = np.arange(elevation_range[0],
                               elevation_range[1] + 0.5 * elevation_resolution,
                               elevation_resolution, dtype=np.float32)
        self.azims = np.arange(azimuth_range[0], azimuth_range[1],
                               azimuth_resolution, dtype=np.float32)
        el_g, az_g = np.meshgrid(self.elevs, self.azims, indexing="ij")
        el_r = np.deg2rad(el_g).ravel()
        az_r = np.deg2rad(az_g).ravel()
        u = np.stack([np.sin(el_r) * np.cos(az_r),
                      np.sin(el_r) * np.sin(az_r),
                      np.cos(el_r)], axis=-1).astype(np.float32)      # (D, 3)
        self.D = u.shape[0]

        # per-pair TDOA for each candidate direction:  tau[d, p]
        dpos = mic_pos[self.pairs[:, 0]] - mic_pos[self.pairs[:, 1]]  # (P, 3)
        tau = (u @ dpos.T) / c_sound                                  # (D, P)

        # rFFT bins (optionally band-limited)
        n_freq_full = self.n_fft // 2 + 1
        freqs = np.arange(n_freq_full, dtype=np.float32) * (sample_rate / self.n_fft)
        if frequency_range is not None:
            keep = np.nonzero((freqs >= frequency_range[0]) &
                              (freqs <= frequency_range[1]))[0]
        else:
            keep = np.arange(n_freq_full)
        self.freq_idx = keep
        freqs = freqs[keep]
        self.n_freq = freqs.shape[0]

        self.K = n_pairs * self.n_freq
        self.K_pad = _round_up(self.K, 128)

        # D tile: lane-aligned, sized so the double-buffered bf16 steering tile
        # fits the pass-2 VMEM budget (works for fine grids / v7x's 64 MiB VMEM).
        d_pad_min = _round_up(self.D, 128)
        s_col_bytes = 2 * self.K_pad * 2                       # bf16, Re + Im rows
        dt_cap = max(128, (self.s_vmem_budget // (2 * s_col_bytes)) // 128 * 128)
        self.D_tile = int(min(int(d_tile_target), dt_cap, d_pad_min))
        self.D_pad = _round_up(self.D, self.D_tile)

        # steering matrix  P = gr @ cos(phase).T + gi @ sin(phase).T
        # (i.e. P(d) = sum_k Re{ Chat_k * exp(-j*phase_dk) }, identical math to the
        #  previous fused [Sr ; -Si] layout)
        phase = 2.0 * np.pi * tau[:, :, None] * freqs[None, None, :]  # (D, P, F)
        sr = np.cos(phase).reshape(self.D, -1)                        # (D, K)
        si = np.sin(phase).reshape(self.D, -1)
        S = np.zeros((2, self.K_pad, self.D_pad), np.float32)
        S[0, :self.K, :self.D] = sr.T
        S[1, :self.K, :self.D] = si.T
        self.S = jnp.asarray(S, jnp.bfloat16)

        # analysis window (torch.hann_window default: periodic)
        n = np.arange(self.window_length, dtype=np.float32)
        if window_type == "hann":
            win = 0.5 - 0.5 * np.cos(2.0 * np.pi * n / self.window_length)
        else:
            win = np.ones(self.window_length, np.float32)
        self.window = jnp.asarray(win, jnp.float32)

    # ---- STFT + mic-pair cross spectra (plain-JAX glue), laid out for the kernel.
    # TODO(synk): STFT framing + rFFT have no Pallas equivalent (XLA FFT is used).
    def _cross_spectra(self, x):
        B, M, T = x.shape
        assert M == self.n_mics
        xw = x
        if self.center:
            pad = self.n_fft // 2
            xw = jnp.pad(xw, ((0, 0), (0, 0), (pad, pad)), mode="reflect")
            T = xw.shape[-1]
        n_frames = (T - self.window_length) // self.hop_length + 1
        idx = (np.arange(n_frames)[:, None] * self.hop_length +
               np.arange(self.window_length)[None, :])
        frames = xw[:, :, idx] * self.window                    # (B, M, Tf, W)
        X = jnp.fft.rfft(frames, n=self.n_fft, axis=-1)         # (B, M, Tf, F_full)
        X = X[..., self.freq_idx]                               # (B, M, Tf, F)

        # move the (small) mic axis behind frames BEFORE forming cross spectra, so
        # the (bigger) cross-spectra tensor needs no transpose afterwards.
        Xp = jnp.swapaxes(X, 1, 2)                              # (B, Tf, M, F)
        Xi = Xp[:, :, self.pairs[:, 0], :]                      # (B, Tf, P, F)
        Xj = Xp[:, :, self.pairs[:, 1], :]
        C = Xi * jnp.conj(Xj)                                   # cross spectra
        Cs = jnp.stack([jnp.real(C), jnp.imag(C)], axis=0)      # (2, B, Tf, P, F)
        Cs = Cs.reshape(2, B, n_frames, self.K).astype(jnp.bfloat16)

        # pad batch (sublane-align) and K (lane-align): zeros contribute exactly
        # nothing after whitening (rsqrt(eps^2)*0 = 0), so the padded entries are
        # harmless.  B-padding wastes some VPU work only for tiny batches.
        Bp = _round_up(B, 8)
        Cs = jnp.pad(Cs, ((0, 0), (0, Bp - B), (0, 0), (0, self.K_pad - self.K)))

        # frame tiling: short signals keep C fully resident (single step, no T pad);
        # long signals stream in large multiple-of-8 tiles sized from the budget.
        bytes_per_frame = 2 * Bp * self.K_pad * 2               # bf16, Re + Im
        t_cap = max(8, (self.c_vmem_budget // (2 * bytes_per_frame)) // 8 * 8)
        if n_frames <= min(t_cap, self.frame_tile_target):
            t_tile = n_frames                                   # no T padding at all
            Tp = n_frames
        else:
            t_tile = int(min(t_cap, self.frame_tile_target))
            Tp = _round_up(n_frames, t_tile)
            # TODO(synk): mask the ragged last frame tile in-kernel instead of
            # padding, to avoid one extra full read+write pass over C.
            Cs = jnp.pad(Cs, ((0, 0), (0, 0), (0, Tp - n_frames), (0, 0)))

        needed = 2 * bytes_per_frame * t_tile + 2 * Bp * self.K_pad * 4
        vmem_limit = _clamp_vmem(needed)
        return Cs, t_tile, vmem_limit

    def __call__(self, x, return_map=False):
        B = x.shape[0]
        Cs, t_tile, vmem1 = self._cross_spectra(x)
        Bp = Cs.shape[1]

        # Pass 1: stream C once, whiten, reduce over frames  ->  G (2, Bp, Kp) f32
        G = srp_whiten_reduce(Cs, eps=self.eps, t_tile=t_tile, vmem_limit=vmem1)

        # Pass 2: one fused bf16 MXU matmul per D tile (parallel over D tiles)
        needed2 = (2 * (2 * self.K_pad * self.D_tile * 2)       # S tile, double-buffered
                   + 2 * Bp * self.K_pad * 4                    # G (resident, f32)
                   + 2 * Bp * self.D_tile * 4)                  # output tile, f32
        vmem2 = _clamp_vmem(needed2)
        P_pad = srp_steered_power(G, self.S, d_tile=self.D_tile, vmem_limit=vmem2)

        P = P_pad[:B, :self.D]                                  # (B, D) SRP map
        idx = jnp.argmax(P, axis=-1)
        n_az = self.azims.shape[0]
        elev = jnp.asarray(self.elevs)[idx // n_az]
        azim = jnp.asarray(self.azims)[idx % n_az]
        doa = jnp.stack([elev, azim], axis=-1).astype(jnp.float32)   # (B, 2) degrees
        if return_map:
            return doa, P
        return doa


if __name__ == "__main__":
    # deterministic microphone geometry: square array, 5 cm radius
    mic_positions = np.array([[0.05, 0.00, 0.0],
                              [0.00, 0.05, 0.0],
                              [-0.05, 0.00, 0.0],
                              [0.00, -0.05, 0.0]], np.float32)

    model = SRPPHATDoAPallas(
        n_fft=64, window_length=64, hop_length=32,
        microphone_positions=mic_positions,
        sample_rate=16000, center=False, window_type="hann",
        elevation_resolution=30.0, azimuth_resolution=30.0,
        elevation_range=(0.0, 180.0), azimuth_range=(-180.0, 180.0),
        c_sound=343.0, frequency_range=None)

    key = jax.random.PRNGKey(0)
    B, M, T = 2, 4, 256
    x = jax.random.normal(key, (B, M, T), dtype=jnp.float32)

    doa, pmap = model(x, return_map=True)
    doa = jax.block_until_ready(doa)
    pmap = jax.block_until_ready(pmap)

    # sanity check the Pallas power map against a pure-JAX reference that mirrors
    # the kernel's bf16 quantization path
    Cs, _, _ = model._cross_spectra(x)
    p_ref = _ref_power_map(Cs, model.S, eps=model.eps)[:B, :model.D]
    np.testing.assert_allclose(np.asarray(pmap), np.asarray(p_ref),
                               rtol=2e-2, atol=5e-2)
    assert doa.shape == (B, 2) and doa.dtype == jnp.float32

    print("KERNEL_OK")
</pallas_src>

<mosaic_0001>
module attributes {stable_mosaic.version = 11 : i64} {
  func.func @_whiten_reduce_kernel(%arg0: i32, %arg1: memref<2x8x7x256xbf16, #tpu.memory_space<vmem>>, %arg2: memref<2x8x256xf32, #tpu.memory_space<vmem>>) attributes {dimension_semantics = [#tpu.dimension_semantics<arbitrary>], iteration_bounds = array<i64: 1>, scalar_prefetch = 0 : i64, scratch_operands = 0 : i64, tpu.core_type = #tpu.core_type<tc>, window_params = [{transform_indices = @transform_0, window_bounds = array<i64: 2, 8, 7, 256>}, {pipeline_mode = #tpu.pipeline_mode<synchronous>, transform_indices = @transform_1, window_bounds = array<i64: 2, 8, 256>}]} {
    %c0_i32 = arith.constant 0 : i32
    %0 = arith.cmpi eq, %arg0, %c0_i32 : i32
    %1 = arith.extui %0 : i1 to i32
    %c0_i32_0 = arith.constant 0 : i32
    %2 = arith.cmpi ne, %1, %c0_i32_0 : i32
    scf.if %2 {
      %cst_21 = arith.constant 0.000000e+00 : f32
      %31 = vector.broadcast %cst_21 : f32 to vector<2x8x256xf32>
      %c0_22 = arith.constant 0 : index
      %c0_23 = arith.constant 0 : index
      %c0_24 = arith.constant 0 : index
      %32 = vector.load %arg2[%c0_22, %c0_23, %c0_24] : memref<2x8x256xf32, #tpu.memory_space<vmem>>, vector<2x8x256xf32>
      tpu.vector_store %arg2[%c0_22, %c0_23, %c0_24], %31 {strides = array<i32>} : memref<2x8x256xf32, #tpu.memory_space<vmem>>, vector<2x8x256xf32>,
    } else {
    }
    %c0 = arith.constant 0 : index
    %c0_1 = arith.constant 0 : index
    %c0_2 = arith.constant 0 : index
    %c0_3 = arith.constant 0 : index
    %3 = vector.load %arg1[%c0, %c0_1, %c0_2, %c0_3] : memref<2x8x7x256xbf16, #tpu.memory_space<vmem>>, vector<1x8x7x256xbf16>
    %4 = vector.shape_cast %3 : vector<1x8x7x256xbf16> to vector<8x7x256xbf16>
    %5 = arith.extf %4 : vector<8x7x256xbf16> to vector<8x7x256xf32>
    %c1 = arith.constant 1 : index
    %c0_4 = arith.constant 0 : index
    %c0_5 = arith.constant 0 : index
    %c0_6 = arith.constant 0 : index
    %6 = vector.load %arg1[%c1, %c0_4, %c0_5, %c0_6] : memref<2x8x7x256xbf16, #tpu.memory_space<vmem>>, vector<1x8x7x256xbf16>
    %7 = vector.shape_cast %6 : vector<1x8x7x256xbf16> to vector<8x7x256xbf16>
    %8 = arith.extf %7 : vector<8x7x256xbf16> to vector<8x7x256xf32>
    %9 = arith.mulf %5, %5 : vector<8x7x256xf32>
    %10 = arith.mulf %8, %8 : vector<8x7x256xf32>
    %11 = arith.addf %9, %10 : vector<8x7x256xf32>
    %cst = arith.constant 1.000000e-16 : f32
    %12 = vector.broadcast %cst : f32 to vector<8x7x256xf32>
    %13 = arith.addf %11, %12 : vector<8x7x256xf32>
    %14 = math.rsqrt %13 : vector<8x7x256xf32>
    %c0_7 = arith.constant 0 : index
    %c0_8 = arith.constant 0 : index
    %c0_9 = arith.constant 0 : index
    %15 = vector.load %arg2[%c0_7, %c0_8, %c0_9] : memref<2x8x256xf32, #tpu.memory_space<vmem>>, vector<1x8x256xf32>
    %16 = vector.shape_cast %15 : vector<1x8x256xf32> to vector<8x256xf32>
    %17 = arith.mulf %5, %14 : vector<8x7x256xf32>
    %cst_10 = arith.constant dense<0.000000e+00> : vector<8x256xf32>
    %18 = vector.multi_reduction <add>, %17, %cst_10 [1] : vector<8x7x256xf32> to vector<8x256xf32>
    %19 = arith.addf %16, %18 : vector<8x256xf32>
    %c0_11 = arith.constant 0 : index
    %c0_12 = arith.constant 0 : index
    %c0_13 = arith.constant 0 : index
    %20 = vector.load %arg2[%c0_11, %c0_12, %c0_13] : memref<2x8x256xf32, #tpu.memory_space<vmem>>, vector<1x8x256xf32>
    %21 = vector.shape_cast %20 : vector<1x8x256xf32> to vector<8x256xf32>
    %22 = vector.shape_cast %19 : vector<8x256xf32> to vector<1x8x256xf32>
    tpu.vector_store %arg2[%c0_11, %c0_12, %c0_13], %22 {strides = array<i32>} : memref<2x8x256xf32, #tpu.memory_space<vmem>>, vector<1x8x256xf32>,
    %c1_14 = arith.constant 1 : index
    %c0_15 = arith.constant 0 : index
    %c0_16 = arith.constant 0 : index
    %23 = vector.load %arg2[%c1_14, %c0_15, %c0_16] : memref<2x8x256xf32, #tpu.memory_space<vmem>>, vector<1x8x256xf32>
    %24 = vector.shape_cast %23 : vector<1x8x256xf32> to vector<8x256xf32>
    %25 = arith.mulf %8, %14 : vector<8x7x256xf32>
    %cst_17 = arith.constant dense<0.000000e+00> : vector<8x256xf32>
    %26 = vector.multi_reduction <add>, %25, %cst_17 [1] : vector<8x7x256xf32> to vector<8x256xf32>
    %27 = arith.addf %24, %26 : vector<8x256xf32>
    %c1_18 = arith.constant 1 : index
    %c0_19 = arith.constant 0 : index
    %c0_20 = arith.constant 0 : index
    %28 = vector.load %arg2[%c1_18, %c0_19, %c0_20] : memref<2x8x256xf32, #tpu.memory_space<vmem>>, vector<1x8x256xf32>
    %29 = vector.shape_cast %28 : vector<1x8x256xf32> to vector<8x256xf32>
    %30 = vector.shape_cast %27 : vector<8x256xf32> to vector<1x8x256xf32>
    tpu.vector_store %arg2[%c1_18, %c0_19, %c0_20], %30 {strides = array<i32>} : memref<2x8x256xf32, #tpu.memory_space<vmem>>, vector<1x8x256xf32>,
    return
  }
  func.func @transform_0(%arg0: i32) -> (i32, i32, i32, i32) {
    %c0_i32 = arith.constant 0 : i32
    %c0_i32_0 = arith.constant 0 : i32
    %c0_i32_1 = arith.constant 0 : i32
    %c0_i32_2 = arith.constant 0 : i32
    return %c0_i32, %c0_i32_0, %arg0, %c0_i32_1 : i32, i32, i32, i32
  }
  func.func @transform_1(%arg0: i32) -> (i32, i32, i32) {
    %c0_i32 = arith.constant 0 : i32
    %c0_i32_0 = arith.constant 0 : i32
    %c0_i32_1 = arith.constant 0 : i32
    %c0_i32_2 = arith.constant 0 : i32
    return %c0_i32, %c0_i32_0, %c0_i32_1 : i32, i32, i32
  }
}

</mosaic_0001>

<bundles_post_ra>
// kernel: tpu_custom_call.1
= control target key start
LH: loop header
LB: loop body
LE: loop exit
PB: predicated region body
PF: predicated region fallthrough
CT: control target
= control target key end

     0   :  { %s1034_s0 = inlined_call_operand.vmem [shape: bf16[2,8,7,256], index: 0, kind: input, shape index: {}]   ;;  %s1035_s1 = inlined_call_operand.hbm [shape: f32[2,8,256], index: 1, kind: output, shape index: {}]  }
   0x1   :  { %v587_v0 = vld [vmem:[%s1034_s0] sm:$0xff]  ;;  %v592_v1 = vld [vmem:[%s1034_s0 + $0x8] sm:$0xff]  ;;  %v597_v2 = vld [vmem:[%s1034_s0 + $0x10] sm:$0xff] }
   0x2   :  { %v602_v3 = vld [vmem:[%s1034_s0 + $0x18] sm:$0xff]  ;;  %v607_v4 = vld [vmem:[%s1034_s0 + $0x20] sm:$0xff]  ;;  %v612_v5 = vld [vmem:[%s1034_s0 + $0x28] sm:$0xff]  ;;  %v615_v6 = vunpack.c.l.bf16 %v587_v0  ;;  %v618_v7 = vunpack.c.l.bf16 %v592_v1  ;;  %v621_v8 = vunpack.c.l.bf16 %v597_v2 }
   0x3   :  { %v626_v9 = vld [vmem:[%s1034_s0 + $0x30] sm:$0xff]  ;;  %v631_v10 = vld [vmem:[%s1034_s0 + $0x38] sm:$0xff]  ;;  %v634_v11 = vunpack.c.l.bf16 %v602_v3  ;;  %v637_v12 = vunpack.c.l.bf16 %v607_v4  ;;  %v640_v13 = vunpack.c.l.bf16 %v612_v5  ;;  %v645_v14 = vld [vmem:[%s1034_s0 + $0x40] sm:$0xff] }
   0x4   :  { %v648_v15 = vunpack.c.l.bf16 %v626_v9  ;;  %v651_v16 = vunpack.c.l.bf16 %v631_v10  ;;  %v656_v17 = vld [vmem:[%s1034_s0 + $0x48] sm:$0xff]  ;;  %v661_v18 = vld [vmem:[%s1034_s0 + $0x50] sm:$0xff]  ;;  %v666_v19 = vld [vmem:[%s1034_s0 + $0x58] sm:$0xff]  ;;  %v669_v20 = vunpack.c.l.bf16 %v645_v14  ;;  %v66_v21 = vmul.f32 %v615_v6, %v615_v6 }
   0x5   :  { %v507_v22 = vld [vmem:[%s1034_s0 + $0x60] sm:$0xff]  ;;  %v508_v23 = vld [vmem:[%s1034_s0 + $0x68] sm:$0xff]  ;;  %v509_v24 = vld [vmem:[%s1034_s0 + $0x70] sm:$0xff]  ;;  %v683_v25 = vunpack.c.l.bf16 %v656_v17  ;;  %v686_v26 = vunpack.c.l.bf16 %v661_v18  ;;  %v689_v27 = vunpack.c.l.bf16 %v666_v19  ;;  %v68_v28 = vmul.f32 %v618_v7, %v618_v7 }
   0x6   :  { %v510_v29 = vld [vmem:[%s1034_s0 + $0x78] sm:$0xff]  ;;  %v696_v30 = vunpack.c.l.bf16 %v507_v22  ;;  %v698_v31 = vunpack.c.l.bf16 %v508_v23  ;;  %v700_v32 = vunpack.c.l.bf16 %v509_v24  ;;  %v70_v33 = vmul.f32 %v621_v8, %v621_v8 }
   0x7   :  { %6 = vsyncpa [#allocation3], 0  ;;  %v704_v34 = vunpack.c.l.bf16 %v510_v29  ;;  %v72_v35 = vmul.f32 %v634_v11, %v634_v11  ;;  %v74_v36 = vmul.f32 %v637_v12, %v637_v12  ;;  %v76_v37 = vmul.f32 %v640_v13, %v640_v13  ;;  %s571_s0 = smov [#allocation2]  }
   0x8   :  { %v78_v38 = vmul.f32 %v648_v15, %v648_v15  ;;  %v80_v39 = vmul.f32 %v651_v16, %v651_v16  ;;  %v82_v40 = vmul.f32 %v669_v20, %v669_v20  ;;  %v84_v41 = vmul.f32 %v683_v25, %v683_v25  ;;  %s492_s9 = sshll.u32 %s571_s0, 4  ;;  %s493_s9 = int_to_ptr.vmem [resolvable:$true] %s492_s9 }
   0x9   :  { %v86_v42 = vmul.f32 %v686_v26, %v686_v26  ;;  %v88_v43 = vmul.f32 %v689_v27, %v689_v27  ;;  %v90_v44 = vmul.f32 %v696_v30, %v696_v30  ;;  %v92_v45 = vmul.f32 %v698_v31, %v698_v31  ;;  %s547_s10 = scalar_lea.vmem %s493_s9, 512  ;;  %p552_p1 = scmp.lt.s32.totalorder %s493_s9, %s493_s9 }
   0xa   :  { %v94_v46 = vmul.f32 %v700_v32, %v700_v32  ;;  %v96_v47 = vmul.f32 %v704_v34, %v704_v34  ;;  %v98_v48 = vadd.f32 %v82_v40, %v66_v21  ;;  %v100_v49 = vadd.f32 %v84_v41, %v68_v28  ;;  %p548_p0 = scmp.ne.s32.totalorder %s493_s9, %s547_s10  ;;  %p553_p2 = scmp.lt.s32.totalorder %s547_s10, %s547_s10 }
   0xb   :  { %v102_v50 = vadd.f32 %v86_v42, %v70_v33  ;;  %v104_v51 = vadd.f32 %v88_v43, %v72_v35  ;;  %v106_v52 = vadd.f32 %v90_v44, %v74_v36  ;;  %v108_v53 = vadd.f32 %v92_v45, %v76_v37 }
   0xc   :  { %v110_v54 = vadd.f32 %v94_v46, %v78_v38  ;;  %v112_v55 = vadd.f32 %v96_v47, %v80_v39  ;;  %v114_v56 = vadd.f32 1e-16, %v98_v48  ;;  %v116_v57 = vadd.f32 1e-16, %v100_v49  ;;  %p554_p3 = por %p553_p2, %p552_p1 }
   0xd   :  { %v118_v58 = vadd.f32 1e-16, %v102_v50  ;;  %v120_v59 = vadd.f32 1e-16, %v104_v51  ;;  %v122_v60 = vadd.f32 1e-16, %v106_v52  ;;  %v733_v63 = vunpack.c.h.bf16 %v587_v0 }
   0xe   :  { %515 = vrsqrt.f32 %v114_v56  ;;  %v124_v61 = vadd.f32 1e-16, %v108_v53  ;;  %v126_v62 = vadd.f32 1e-16, %v110_v54  ;;  %v128_v21 = vadd.f32 1e-16, %v112_v55  ;;  %p555_p4 = pnand %p554_p3, %p548_p0 }
   0xf   :  { %517 = vrsqrt.f32 %v116_v57  ;;  %vm164_vm0 = vcmask 1046528   ;;  %v736_v28 = vunpack.c.h.bf16 %v592_v1  ;;  %v739_v33 = vunpack.c.h.bf16 %v597_v2 }
  0x10   :  { %519 = vrsqrt.f32 %v118_v58  ;;  %v742_v35 = vunpack.c.h.bf16 %v602_v3  ;;  %v745_v36 = vunpack.c.h.bf16 %v607_v4  ;;  %v748_v37 = vunpack.c.h.bf16 %v612_v5 }
  0x11   :  { %521 = vrsqrt.f32 %v120_v59  ;;  %v751_v0 = vunpack.c.h.bf16 %v626_v9  ;;  %v754_v1 = vunpack.c.h.bf16 %v631_v10  ;;  %v757_v2 = vunpack.c.h.bf16 %v645_v14 }
  0x12   :  { %523 = vrsqrt.f32 %v122_v60  ;;  %v760_v3 = vunpack.c.h.bf16 %v656_v17  ;;  %v763_v4 = vunpack.c.h.bf16 %v661_v18  ;;  %v766_v5 = vunpack.c.h.bf16 %v666_v19 }
  0x13   :  { %525 = vrsqrt.f32 %v124_v61  ;;  %v768_v38 = vunpack.c.h.bf16 %v507_v22  ;;  %v770_v9 = vunpack.c.h.bf16 %v508_v23  ;;  %v772_v10 = vunpack.c.h.bf16 %v509_v24 }
  0x14   :  { %1043 = vst [vmem:[#allocation5_spill] sm:$0xff] %v760_v3  ;;  %1044 = vst [vmem:[#allocation6_spill] sm:$0xff] %v763_v4  ;;  %527 = vrsqrt.f32 %v126_v62  ;;  %v774_v14 = vunpack.c.h.bf16 %v510_v29  ;;  %v67_v17 = vmul.f32 %v733_v63, %v733_v63  ;;  %v69_v18 = vmul.f32 %v736_v28, %v736_v28 }
  0x15   :  { %1045 = vst [vmem:[#allocation7_spill] sm:$0xff] %v766_v5  ;;  %1046 = vst [vmem:[#allocation8_spill] sm:$0xff] %v768_v38  ;;  %529 = vrsqrt.f32 %v128_v21  ;;  %v71_v19 = vmul.f32 %v739_v33, %v739_v33  ;;  %v73_v22 = vmul.f32 %v742_v35, %v742_v35  ;;  %v75_v23 = vmul.f32 %v745_v36, %v745_v36 }
  0x16   :  { %1047 = vst [vmem:[#allocation9_spill] sm:$0xff] %v770_v9  ;;  %1048 = vst [vmem:[#allocation10_spill] sm:$0xff] %v772_v10  ;;  %v77_v24 = vmul.f32 %v748_v37, %v748_v37  ;;  %v79_v29 = vmul.f32 %v751_v0, %v751_v0  ;;  %v81_v39 = vmul.f32 %v754_v1, %v754_v1  ;;  %vm293_vm1 = vcmask 1041409  }
  0x17   :  { %1049 = vst [vmem:[#allocation11_spill] sm:$0xff] %v774_v14  ;;  %v83_v40 = vmul.f32 %v757_v2, %v757_v2  ;;  %v85_v41 = vmul.f32 %v760_v3, %v760_v3  ;;  %v87_v43 = vmul.f32 %v763_v4, %v763_v4  ;;  %v89_v44 = vmul.f32 %v766_v5, %v766_v5 }
  0x18   :  { %v796_v42 = vpop.eup %515  ;;  %v91_v45 = vmul.f32 %v768_v38, %v768_v38  ;;  %v93_v46 = vmul.f32 %v770_v9, %v770_v9  ;;  %v95_v49 = vmul.f32 %v772_v10, %v772_v10  ;;  %v97_v50 = vmul.f32 %v774_v14, %v774_v14 }
  0x19   :  { %v806_v47 = vpop.eup %517  ;;  %v148_v48 = vmul.f32 %v796_v42, %v615_v6  ;;  %v814_v51 = vadd.f32 %v83_v40, %v67_v17  ;;  %v820_v54 = vadd.f32 %v85_v41, %v69_v18  ;;  %v822_v55 = vadd.f32 %v87_v43, %v71_v19 }
  0x1a   :  { %v816_v52 = vpop.eup %519  ;;  %v150_v53 = vmul.f32 %v806_v47, %v618_v7  ;;  %v824_v56 = vadd.f32 %v89_v44, %v73_v22  ;;  %v831_v59 = vadd.f32 %v91_v45, %v75_v23  ;;  %v833_v60 = vadd.f32 %v93_v46, %v77_v24 }
  0x1b   :  { %v826_v6 = vpop.eup %521  ;;  %v152_v57 = vmul.f32 %v816_v52, %v621_v8  ;;  %v165_v58 = vsel %vm164_vm0, %v148_v48, 0.0  ;;  %v840_v17 = vadd.f32 %v95_v49, %v79_v29  ;;  %v847_v23 = vadd.f32 %v97_v50, %v81_v39 }
  0x1c   :  { %v835_v61 = vpop.eup %523  ;;  %v154_v7 = vmul.f32 %v826_v6, %v634_v11  ;;  %v166_v62 = vrot.slane %v165_v58, 4  ;;  %v179_v21 = vsel %vm164_vm0, %v150_v53, 0.0  ;;  %vm295_vm2 = vcmask 1042434  }
  0x1d   :  { %v842_v18 = vpop.eup %525  ;;  %v156_v8 = vmul.f32 %v835_v61, %v637_v12  ;;  %v180_v19 = vrot.slane %v179_v21, 4  ;;  %v193_v22 = vsel %vm164_vm0, %v152_v57, 0.0  ;;  %vm297_vm3 = vcmask 1043459  }
  0x1e   :  { %v849_v24 = vpop.eup %527  ;;  %v158_v11 = vmul.f32 %v842_v18, %v640_v13  ;;  %v167_v40 = vadd.f32 %v166_v62, %v165_v58  ;;  %v194_v41 = vrot.slane %v193_v22, 4  ;;  %v207_v29 = vsel %vm164_vm0, %v154_v7, 0.0 }
  0x1f   :  { %v854_v43 = vpop.eup %529  ;;  %v160_v12 = vmul.f32 %v849_v24, %v648_v15  ;;  %v181_v44 = vadd.f32 %v180_v19, %v179_v21  ;;  %v208_v45 = vrot.slane %v207_v29, 4  ;;  %v221_v39 = vsel %vm164_vm0, %v156_v8, 0.0 }
  0x20   :  { %v162_v46 = vmul.f32 %v854_v43, %v651_v16  ;;  %v168_v48 = vrot.slane %v167_v40, 2  ;;  %v195_v13 = vadd.f32 %v194_v41, %v193_v22  ;;  %v222_v49 = vrot.slane %v221_v39, 4 }
  0x21   :  { %v182_v50 = vrot.slane %v181_v44, 2  ;;  %v209_v53 = vadd.f32 %v208_v45, %v207_v29  ;;  %v235_v57 = vsel %vm164_vm0, %v158_v11, 0.0  ;;  %v249_v58 = vsel %vm164_vm0, %v160_v12, 0.0 }
  0x22   :  { %vm299_vm4 = vcmask 1044484   ;;  %v169_v15 = vadd.f32 %v168_v48, %v167_v40  ;;  %v196_v7 = vrot.slane %v195_v13, 2  ;;  %v223_v62 = vadd.f32 %v222_v49, %v221_v39 }
  0x23   :  { %v236_v21 = vrot.slane %v235_v57, 4  ;;  %v183_v8 = vadd.f32 %v182_v50, %v181_v44  ;;  %v210_v19 = vrot.slane %v209_v53, 2  ;;  %v250_v14 = vrot.slane %v249_v58, 4 }
  0x24   :  { %v263_v16 = vsel %vm164_vm0, %v162_v46, 0.0  ;;  %vm301_vm5 = vcmask 1045509   ;;  %v170_v22 = vrot.slane %v169_v15, 1  ;;  %v197_v41 = vadd.f32 %v196_v7, %v195_v13 }
  0x25   :  { %v224_v10 = vrot.slane %v223_v62, 2  ;;  %v237_v9 = vadd.f32 %v236_v21, %v235_v57  ;;  %vm303_vm6 = vcmask 1046534   ;;  %v184_v29 = vrot.slane %v183_v8, 1 }
  0x26   :  { %v211_v11 = vadd.f32 %v210_v19, %v209_v53  ;;  %v251_v45 = vadd.f32 %v250_v14, %v249_v58  ;;  %v264_v12 = vrot.slane %v263_v16, 4  ;;  %v171_v38 = vadd.f32 %v170_v22, %v169_v15 }
  0x27   :  { %v198_v40 = vrot.slane %v197_v41, 1  ;;  %v225_v48 = vadd.f32 %v224_v10, %v223_v62  ;;  %v238_v39 = vrot.slane %v237_v9, 2  ;;  %vm305_vm7 = vcmask 1047559  }
  0x28   :  { %v185_v44 = vadd.f32 %v184_v29, %v183_v8  ;;  %v212_v49 = vrot.slane %v211_v11, 1  ;;  %v252_v50 = vrot.slane %v251_v45, 2  ;;  %v265_v5 = vadd.f32 %v264_v12, %v263_v16 }
  0x29   :  { %v199_v46 = vadd.f32 %v198_v40, %v197_v41  ;;  %v226_v4 = vrot.slane %v225_v48, 1  ;;  %v239_v3 = vadd.f32 %v238_v39, %v237_v9  ;;  %v115_v13 = vadd.f32 1e-16, %v814_v51 }
  0x2a   :  { %v213_v57 = vadd.f32 %v212_v49, %v211_v11  ;;  %v253_v7 = vadd.f32 %v252_v50, %v251_v45  ;;  %v266_v21 = vrot.slane %v265_v5, 2  ;;  %v294_v14 = vsel %vm293_vm1, %v185_v44, %v171_v38 }
  0x2b   :  { %v227_v53 = vadd.f32 %v226_v4, %v225_v48  ;;  %v240_v58 = vrot.slane %v239_v3, 1  ;;  %v296_v10 = vsel %vm295_vm2, %v199_v46, %v294_v14  ;;  %v117_v15 = vadd.f32 1e-16, %v820_v54 }
  0x2c   :  { %v254_v62 = vrot.slane %v253_v7, 1  ;;  %v267_v8 = vadd.f32 %v266_v21, %v265_v5  ;;  %v298_v19 = vsel %vm297_vm3, %v213_v57, %v296_v10  ;;  %v119_v16 = vadd.f32 1e-16, %v822_v55 }
  0x2d   :  { %v241_v9 = vadd.f32 %v240_v58, %v239_v3  ;;  %v300_v51 = vsel %vm299_vm4, %v227_v53, %v298_v19  ;;  %v121_v22 = vadd.f32 1e-16, %v824_v56  ;;  %v123_v41 = vadd.f32 1e-16, %v831_v59 }
  0x2e   :  { %v255_v38 = vadd.f32 %v254_v62, %v253_v7  ;;  %v268_v4 = vrot.slane %v267_v8, 1  ;;  %v125_v29 = vadd.f32 1e-16, %v833_v60  ;;  %v127_v11 = vadd.f32 1e-16, %v840_v17 }
  0x2f   :  { %v302_v54 = vsel %vm301_vm5, %v241_v9, %v300_v51  ;;  %v129_v5 = vadd.f32 1e-16, %v847_v23  ;;  %531 = vrsqrt.f32 %v115_v13  ;;  %v323_v3 = vmul.f32 %v796_v42, %v669_v20 }
  0x30   :  { %v269_v55 = vadd.f32 %v268_v4, %v267_v8  ;;  %v304_v45 = vsel %vm303_vm6, %v255_v38, %v302_v54  ;;  %533 = vrsqrt.f32 %v117_v15  ;;  %v325_v56 = vmul.f32 %v806_v47, %v683_v25 }
  0x31   :  { %535 = vrsqrt.f32 %v119_v16  ;;  %v327_v59 = vmul.f32 %v816_v52, %v686_v26  ;;  %v329_v60 = vmul.f32 %v826_v6, %v689_v27  ;;  %v331_v17 = vmul.f32 %v835_v61, %v696_v30 }
  0x32   :  { %v306_v23 = vsel %vm305_vm7, %v269_v55, %v304_v45  ;;  %537 = vrsqrt.f32 %v121_v22  ;;  %v333_v20 = vmul.f32 %v842_v18, %v698_v31  ;;  %v335_v42 = vmul.f32 %v849_v24, %v700_v32 }
  0x33   :  { %539 = vrsqrt.f32 %v123_v41  ;;  %v895_v25 = vmul.f32 %v854_v43, %v704_v34  ;;  %v339_v26 = vsel %vm164_vm0, %v323_v3, 0.0  ;;  %v353_v30 = vsel %vm164_vm0, %v325_v56, 0.0  ;;  %318 = vst [vmem:[#allocation2] sm:$0xff] %v306_v23 }
  0x34   :  { %541 = vrsqrt.f32 %v125_v29  ;;  %v340_v27 = vrot.slane %v339_v26, 4  ;;  %v367_v47 = vsel %vm164_vm0, %v327_v59, 0.0  ;;  %v354_v52 = vrot.slane %v353_v30, 4 }
  0x35   :  { %543 = vrsqrt.f32 %v127_v11  ;;  %v368_v31 = vrot.slane %v367_v47, 4  ;;  %v381_v6 = vsel %vm164_vm0, %v329_v60, 0.0  ;;  %v395_v34 = vsel %vm164_vm0, %v331_v17, 0.0 }
  0x36   :  { %545 = vrsqrt.f32 %v129_v5  ;;  %v341_v32 = vadd.f32 %v340_v27, %v339_v26  ;;  %v382_v61 = vrot.slane %v381_v6, 4  ;;  %v355_v18 = vadd.f32 %v354_v52, %v353_v30 }
  0x37   :  { %v369_v24 = vadd.f32 %v368_v31, %v367_v47  ;;  %v396_v43 = vrot.slane %v395_v34, 4  ;;  %v409_v12 = vsel %vm164_vm0, %v333_v20, 0.0  ;;  %v904_v44 = vsel %vm164_vm0, %v335_v42, 0.0 }
  0x38   :  { %v342_v40 = vrot.slane %v341_v32, 2  ;;  %v383_v48 = vadd.f32 %v382_v61, %v381_v6  ;;  %v410_v39 = vrot.slane %v409_v12, 4  ;;  %v356_v50 = vrot.slane %v355_v18, 2 }
  0x39   :  { %v906_v49 = vpop.eup %531  ;;  %v370_v46 = vrot.slane %v369_v24, 2  ;;  %v908_v13 = vadd.f32 %v396_v43, %v395_v34  ;;  %v424_v57 = vrot.slane %v904_v44, 4 }
  0x3a   :  { %v911_v7 = vpop.eup %533  ;;  %v149_v21 = vmul.f32 %v906_v49, %v733_v63  ;;  %v343_v14 = vadd.f32 %v342_v40, %v341_v32  ;;  %v384_v53 = vrot.slane %v383_v48, 2  ;;  %v915_v58 = vadd.f32 %v410_v39, %v409_v12 }
  0x3b   :  { %v917_v10 = vpop.eup %535  ;;  %v151_v15 = vmul.f32 %v911_v7, %v736_v28  ;;  %v921_v62 = vadd.f32 %v356_v50, %v355_v18  ;;  %v923_v8 = vadd.f32 %v370_v46, %v369_v24  ;;  %v398_v19 = vrot.slane %v908_v13, 2 }
  0x3c   :  { %v926_v16 = vpop.eup %537  ;;  %v153_v63 = vmul.f32 %v917_v10, %v739_v33  ;;  %v172_v9 = vsel %vm164_vm0, %v149_v21, 0.0  ;;  %v344_v51 = vrot.slane %v343_v14, 1  ;;  %v931_v22 = vadd.f32 %v384_v53, %v383_v48 }
  0x3d   :  { %v933_v41 = vpop.eup %539  ;;  %v155_v28 = vmul.f32 %v926_v16, %v742_v35  ;;  %v173_v38 = vrot.slane %v172_v9, 4  ;;  %v186_v4 = vsel %vm164_vm0, %v151_v15, 0.0  ;;  %v358_v29 = vrot.slane %v921_v62, 1 }
  0x3e   :  { %v939_v11 = vpop.eup %541  ;;  %v157_v33 = vmul.f32 %v933_v41, %v745_v36  ;;  %v187_v54 = vrot.slane %v186_v4, 4  ;;  %v200_v5 = vsel %vm164_vm0, %v153_v63, 0.0  ;;  %v944_v3 = vadd.f32 %v344_v51, %v343_v14 }
  0x3f   :  { %v946_v55 = vpop.eup %543  ;;  %v159_v35 = vmul.f32 %v939_v11, %v748_v37  ;;  %v174_v45 = vadd.f32 %v173_v38, %v172_v9  ;;  %v201_v56 = vrot.slane %v200_v5, 4  ;;  %v214_v59 = vsel %vm164_vm0, %v155_v28, 0.0 }
  0x40   :  { %v951_v60 = vpop.eup %545  ;;  %v161_v17 = vmul.f32 %v946_v55, %v751_v0  ;;  %v188_v36 = vadd.f32 %v187_v54, %v186_v4  ;;  %v215_v23 = vrot.slane %v214_v59, 4  ;;  %v228_v20 = vsel %vm164_vm0, %v157_v33, 0.0 }
  0x41   :  { %v163_v42 = vmul.f32 %v951_v60, %v754_v1  ;;  %v175_v26 = vrot.slane %v174_v45, 2  ;;  %v202_v27 = vadd.f32 %v201_v56, %v200_v5  ;;  %v229_v30 = vrot.slane %v228_v20, 4 }
  0x42   :  { %v189_v37 = vrot.slane %v188_v36, 2  ;;  %v216_v47 = vadd.f32 %v215_v23, %v214_v59  ;;  %v242_v52 = vsel %vm164_vm0, %v159_v35, 0.0  ;;  %v256_v31 = vsel %vm164_vm0, %v161_v17, 0.0 }
  0x43   :  { %v176_v6 = vadd.f32 %v175_v26, %v174_v45  ;;  %v203_v32 = vrot.slane %v202_v27, 2  ;;  %v230_v61 = vadd.f32 %v229_v30, %v228_v20  ;;  %v243_v0 = vrot.slane %v242_v52, 4 }
  0x44   :  { %v190_v34 = vadd.f32 %v189_v37, %v188_v36  ;;  %v217_v18 = vrot.slane %v216_v47, 2  ;;  %v257_v24 = vrot.slane %v256_v31, 4  ;;  %v270_v43 = vsel %vm164_vm0, %v163_v42, 0.0 }
  0x45   :  { %v177_v12 = vrot.slane %v176_v6, 1  ;;  %v204_v1 = vadd.f32 %v203_v32, %v202_v27  ;;  %v231_v40 = vrot.slane %v230_v61, 2  ;;  %v244_v48 = vadd.f32 %v243_v0, %v242_v52 }
  0x46   :  { %v191_v39 = vrot.slane %v190_v34, 1  ;;  %v218_v50 = vadd.f32 %v217_v18, %v216_v47  ;;  %v258_v46 = vadd.f32 %v257_v24, %v256_v31  ;;  %v271_v21 = vrot.slane %v270_v43, 4 }
  0x47   :  { %v178_v14 = vadd.f32 %v177_v12, %v176_v6  ;;  %v205_v53 = vrot.slane %v204_v1, 1  ;;  %v232_v15 = vadd.f32 %v231_v40, %v230_v61  ;;  %v245_v63 = vrot.slane %v244_v48, 2 }
  0x48   :  { %v192_v9 = vadd.f32 %v191_v39, %v190_v34  ;;  %v219_v51 = vrot.slane %v218_v50, 1  ;;  %v259_v28 = vrot.slane %v258_v46, 2  ;;  %v272_v38 = vadd.f32 %v271_v21, %v270_v43 }
  0x49   :  { %v206_v4 = vadd.f32 %v205_v53, %v204_v1  ;;  %v233_v33 = vrot.slane %v232_v15, 1  ;;  %v246_v54 = vadd.f32 %v245_v63, %v244_v48  ;;  %v359_v5 = vadd.f32 %v358_v29, %v921_v62  ;;  %v1053_v63 = vld [vmem:[#allocation8_spill] sm:$0xff] }
  0x4a   :  { %v220_v35 = vadd.f32 %v219_v51, %v218_v50  ;;  %v260_v45 = vadd.f32 %v259_v28, %v258_v46  ;;  %v273_v56 = vrot.slane %v272_v38, 2  ;;  %v307_v59 = vsel %vm293_vm1, %v192_v9, %v178_v14  ;;  %v1050_v50 = vld [vmem:[#allocation5_spill] sm:$0xff] }
  0x4b   :  { %v234_v17 = vadd.f32 %v233_v33, %v232_v15  ;;  %v247_v36 = vrot.slane %v246_v54, 1  ;;  %v308_v23 = vsel %vm295_vm2, %v206_v4, %v307_v59  ;;  %v372_v20 = vrot.slane %v923_v8, 1  ;;  %v1054_v51 = vld [vmem:[#allocation9_spill] sm:$0xff]  ;;  %v1055_v4 = vld [vmem:[#allocation10_spill] sm:$0xff] }
  0x4c   :  { %v261_v42 = vrot.slane %v260_v45, 1  ;;  %v274_v26 = vadd.f32 %v273_v56, %v272_v38  ;;  %v309_v27 = vsel %vm297_vm3, %v220_v35, %v308_v23  ;;  %v386_v30 = vrot.slane %v931_v22, 1 }
  0x4d   :  { %v248_v37 = vadd.f32 %v247_v36, %v246_v54  ;;  %v310_v62 = vsel %vm299_vm4, %v234_v17, %v309_v27  ;;  %v373_v29 = vadd.f32 %v372_v20, %v923_v8  ;;  %v399_v47 = vadd.f32 %v398_v19, %v908_v13  ;;  %v1056_v54 = vld [vmem:[#allocation11_spill] sm:$0xff] }
  0x4e   :  { %v262_v52 = vadd.f32 %v261_v42, %v260_v45  ;;  %v275_v31 = vrot.slane %v274_v26, 1  ;;  %v387_v6 = vadd.f32 %v386_v30, %v931_v22  ;;  %v412_v32 = vrot.slane %v915_v58, 2 }
  0x4f   :  { %v311_v61 = vsel %vm301_vm5, %v248_v37, %v310_v62  ;;  %v400_v0 = vrot.slane %v399_v47, 1  ;;  %v425_v34 = vadd.f32 %v424_v57, %v904_v44  ;;  %v437_v8 = vsel %vm164_vm0, %v895_v25, 0.0 }
  0x50   :  { %v276_v18 = vadd.f32 %v275_v31, %v274_v26  ;;  %v312_v24 = vsel %vm303_vm6, %v262_v52, %v311_v61  ;;  %v413_v13 = vadd.f32 %v412_v32, %v915_v58  ;;  %v438_v19 = vrot.slane %v437_v8, 4 }
  0x51   :  { %v401_v43 = vadd.f32 %v400_v0, %v399_v47  ;;  %v426_v22 = vrot.slane %v425_v34, 2  ;;  %v467_v12 = vsel %vm293_vm1, %v359_v5, %v944_v3  ;;  %v324_v1 = vmul.f32 %v906_v49, %v757_v2  ;;  %v1051_v3 = vld [vmem:[#allocation6_spill] sm:$0xff]  ;;  %v1052_v49 = vld [vmem:[#allocation7_spill] sm:$0xff] }
  0x52   :  { %v313_v40 = vsel %vm305_vm7, %v276_v18, %v312_v24  ;;  %v414_v44 = vrot.slane %v413_v13, 1  ;;  %v439_v57 = vadd.f32 %v438_v19, %v437_v8  ;;  %v468_v25 = vsel %vm295_vm2, %v373_v29, %v467_v12 }
  0x53   :  { %v427_v48 = vadd.f32 %v426_v22, %v425_v34  ;;  %v469_v39 = vsel %vm297_vm3, %v387_v6, %v468_v25  ;;  %v326_v58 = vmul.f32 %v911_v7, %v1050_v50  ;;  %v328_v53 = vmul.f32 %v917_v10, %v1051_v3  ;;  %319 = vst [vmem:[#allocation2 + $0x8] sm:$0xff] %v313_v40 }
  0x54   :  { %v415_v46 = vadd.f32 %v414_v44, %v413_v13  ;;  %v440_v21 = vrot.slane %v439_v57, 2  ;;  %v470_v14 = vsel %vm299_vm4, %v401_v43, %v469_v39  ;;  %v330_v15 = vmul.f32 %v926_v16, %v1052_v49 }
  0x55   :  { %v428_v2 = vrot.slane %v427_v48, 1  ;;  %v332_v9 = vmul.f32 %v933_v41, %v1053_v63  ;;  %v334_v28 = vmul.f32 %v939_v11, %v1054_v51  ;;  %v336_v33 = vmul.f32 %v946_v55, %v1055_v4 }
  0x56   :  { %v441_v38 = vadd.f32 %v440_v21, %v439_v57  ;;  %v471_v7 = vsel %vm301_vm5, %v415_v46, %v470_v14  ;;  %v338_v10 = vmul.f32 %v951_v60, %v1056_v54  ;;  %v346_v35 = vsel %vm164_vm0, %v324_v1, 0.0 }
  0x57   :  { %v429_v5 = vadd.f32 %v428_v2, %v427_v48  ;;  %v360_v16 = vsel %vm164_vm0, %v326_v58, 0.0  ;;  %v374_v45 = vsel %vm164_vm0, %v328_v53, 0.0  ;;  %v347_v56 = vrot.slane %v346_v35, 4 }
  0x58   :  { %v442_v41 = vrot.slane %v441_v38, 1  ;;  %v361_v59 = vrot.slane %v360_v16, 4  ;;  %v375_v11 = vrot.slane %v374_v45, 4  ;;  %v388_v36 = vsel %vm164_vm0, %v330_v15, 0.0 }
  0x59   :  { %v472_v17 = vsel %vm303_vm6, %v429_v5, %v471_v7  ;;  %v402_v55 = vsel %vm164_vm0, %v332_v9, 0.0  ;;  %v416_v23 = vsel %vm164_vm0, %v334_v28, 0.0  ;;  %v348_v20 = vadd.f32 %v347_v56, %v346_v35 }
  0x5a   :  { %v443_v60 = vadd.f32 %v442_v41, %v441_v38  ;;  %v362_v42 = vadd.f32 %v361_v59, %v360_v16  ;;  %v376_v26 = vadd.f32 %v375_v11, %v374_v45  ;;  %v389_v27 = vrot.slane %v388_v36, 4 }
  0x5b   :  { %v403_v30 = vrot.slane %v402_v55, 4  ;;  %v417_v37 = vrot.slane %v416_v23, 4  ;;  %v430_v62 = vsel %vm164_vm0, %v336_v33, 0.0  ;;  %v349_v47 = vrot.slane %v348_v20, 2 }
  0x5c   :  { %v473_v29 = vsel %vm305_vm7, %v443_v60, %v472_v17  ;;  %v363_v52 = vrot.slane %v362_v42, 2  ;;  %v377_v31 = vrot.slane %v376_v26, 2  ;;  %v390_v6 = vadd.f32 %v389_v27, %v388_v36 }
  0x5d   :  { %v404_v32 = vadd.f32 %v403_v30, %v402_v55  ;;  %v418_v61 = vadd.f32 %v417_v37, %v416_v23  ;;  %v350_v0 = vadd.f32 %v349_v47, %v348_v20  ;;  %v431_v18 = vrot.slane %v430_v62, 4  ;;  %485 = vst [vmem:[#allocation2 + $0x10] sm:$0xff] %v473_v29 }
  0x5e   :  { %v364_v34 = vadd.f32 %v363_v52, %v362_v42  ;;  %v378_v8 = vadd.f32 %v377_v31, %v376_v26  ;;  %v391_v24 = vrot.slane %v390_v6, 2  ;;  %v444_v43 = vsel %vm164_vm0, %v338_v10, 0.0 }
  0x5f   :  { %v405_v13 = vrot.slane %v404_v32, 2  ;;  %v419_v19 = vrot.slane %v418_v61, 2  ;;  %v351_v22 = vrot.slane %v350_v0, 1  ;;  %v432_v40 = vadd.f32 %v431_v18, %v430_v62 }
  0x60   :  { %v365_v12 = vrot.slane %v364_v34, 1  ;;  %v379_v1 = vrot.slane %v378_v8, 1  ;;  %v392_v44 = vadd.f32 %v391_v24, %v390_v6  ;;  %v445_v48 = vrot.slane %v444_v43, 4 }
  0x61   :  { %v406_v57 = vadd.f32 %v405_v13, %v404_v32  ;;  %v420_v25 = vadd.f32 %v419_v19, %v418_v61  ;;  %v352_v39 = vadd.f32 %v351_v22, %v350_v0  ;;  %v433_v46 = vrot.slane %v432_v40, 2 }
  0x62   :  { %v366_v50 = vadd.f32 %v365_v12, %v364_v34  ;;  %v380_v58 = vadd.f32 %v379_v1, %v378_v8  ;;  %v393_v21 = vrot.slane %v392_v44, 1  ;;  %v446_v53 = vadd.f32 %v445_v48, %v444_v43 }
  0x63   :  { %v407_v14 = vrot.slane %v406_v57, 1  ;;  %v421_v3 = vrot.slane %v420_v25, 1  ;;  %v434_v2 = vadd.f32 %v433_v46, %v432_v40 }
  0x64   :  { %v474_v49 = vsel %vm293_vm1, %v366_v50, %v352_v39  ;;  %v394_v15 = vadd.f32 %v393_v21, %v392_v44  ;;  %v447_v51 = vrot.slane %v446_v53, 2 }
  0x65   :  { %v408_v63 = vadd.f32 %v407_v14, %v406_v57  ;;  %v422_v9 = vadd.f32 %v421_v3, %v420_v25  ;;  %v435_v28 = vrot.slane %v434_v2, 1  ;;  %v475_v38 = vsel %vm295_vm2, %v380_v58, %v474_v49 }
  0x66   :  { %v448_v7 = vadd.f32 %v447_v51, %v446_v53  ;;  %v476_v4 = vsel %vm297_vm3, %v394_v15, %v475_v38 }
  0x67   :  { %v436_v33 = vadd.f32 %v435_v28, %v434_v2  ;;  %v477_v54 = vsel %vm299_vm4, %v408_v63, %v476_v4 }
  0x68   :  { %v449_v10 = vrot.slane %v448_v7, 1  ;;  %v478_v5 = vsel %vm301_vm5, %v422_v9, %v477_v54 }
  0x69   :  { %v479_v35 = vsel %vm303_vm6, %v436_v33, %v478_v5 }
  0x6a   :  { %v450_v16 = vadd.f32 %v449_v10, %v448_v7 }
  0x6c   :  { %v480_v45 = vsel %vm305_vm7, %v450_v16, %v479_v35 }
  0x6d   :  { %486 = vst [vmem:[#allocation2 + $0x18] sm:$0xff] %v480_v45 }
  0x6e   :  { %558 = shalt.err (!%p555_p4)
}
  0x6f   :  { %s559_s13 = scalar_lea.hbm %s1035_s1, 512 }
  0x70   :  { %p560_p5 = scmp.ne.s32.totalorder %s1035_s1, %s559_s13  ;;  %p563_p6 = scmp.lt.u32.totalorder %s559_s13, %s1035_s1 }
  0x72   :  { %p565_p7 = pnand %p563_p6, %p560_p5 }
  0x74   :  { %568 = shalt.err (!%p565_p7)
}
  0x75   :  { %s572_s18 = smov 256   ;;  %s573_s19 = smov 16  }
  0x76   :  { %498 = dma.vmem_to_hbm [thread:$0]  %s493_s9, 512, %s1035_s1, [#allocation3], %s572_s18, %s572_s18, %s573_s19  }
  0x77   :  { %569 = dma.done.wait [#allocation3], 512  }
  0x78   :  { %570 = vsyncadd [#allocation3], 4294966784 }
  0x79   :  { %502 = vsyncpa [#allocation3], 1 }

</bundles_post_ra>
